<compile_context>
chip_gen: v5e
topology: v5e:2x2
jax: 0.10.0
libtpu: 0.0.40
codegen_flags: <defaults>
</compile_context>

<pallas_src>
import functools

import jax
import jax.numpy as jnp
from jax.experimental import pallas as pl
from jax.experimental.pallas import tpu as pltpu


def _round_up(x, m):
    return ((x + m - 1) // m) * m


def _ae_compute(x_ref, w1_ref, b1_ref, w2_ref, b2_ref, w3_ref, b3_ref,
                w4_ref, b4_ref):
    """Shared body: returns (decoded_tile, latent_tile) in f32."""
    # x streamed in f32, cast to bf16 in-register (no wrapper-side pass over x).
    x = x_ref[...].astype(jnp.bfloat16)                         # [TB, in]

    # ---- encoder: Linear -> ReLU -> Dropout(identity) -> Linear ----
    h1 = jnp.dot(x, w1_ref[...], preferred_element_type=jnp.float32) + b1_ref[...]
    h1 = jnp.maximum(h1, 0.0)                                   # ReLU (f32)
    z = jnp.dot(h1.astype(jnp.bfloat16), w2_ref[...],
                preferred_element_type=jnp.float32) + b2_ref[...]

    # ---- decoder: Linear -> ReLU -> Linear ----
    h2 = jnp.dot(z.astype(jnp.bfloat16), w3_ref[...],
                 preferred_element_type=jnp.float32) + b3_ref[...]
    h2 = jnp.maximum(h2, 0.0)                                   # ReLU (f32)
    dec = jnp.dot(h2.astype(jnp.bfloat16), w4_ref[...],
                  preferred_element_type=jnp.float32) + b4_ref[...]
    return dec, z


def _ae_kernel_dec_only(x_ref, w1_ref, b1_ref, w2_ref, b2_ref, w3_ref, b3_ref,
                        w4_ref, b4_ref, dec_ref):
    dec, _ = _ae_compute(x_ref, w1_ref, b1_ref, w2_ref, b2_ref, w3_ref, b3_ref,
                         w4_ref, b4_ref)
    dec_ref[...] = dec          # f32 writeback (bf16 here would halve HBM bytes)


def _ae_kernel_with_latent(x_ref, w1_ref, b1_ref, w2_ref, b2_ref, w3_ref,
                           b3_ref, w4_ref, b4_ref, dec_ref, z_ref):
    dec, z = _ae_compute(x_ref, w1_ref, b1_ref, w2_ref, b2_ref, w3_ref, b3_ref,
                         w4_ref, b4_ref)
    dec_ref[...] = dec
    z_ref[...] = z


def prepare_params(params):
    """One-time prep: cast MXU operands (weights) to bf16; biases stay f32.

    Do this once and reuse across forward calls (keeps ~8 small XLA cast ops
    out of every inference call).
    """
    return dict(
        w1=params["w1"].astype(jnp.bfloat16), b1=params["b1"],
        w2=params["w2"].astype(jnp.bfloat16), b2=params["b2"],
        w3=params["w3"].astype(jnp.bfloat16), b3=params["b3"],
        w4=params["w4"].astype(jnp.bfloat16), b4=params["b4"],
    )


@functools.partial(jax.jit, static_argnames=("return_latent", "tb_max"))
def simple_autoencoder_forward(x, prepared, return_latent=False, tb_max=1024):
    """x: [B, input_dim] float32. prepared: output of prepare_params()."""
    B, input_dim = x.shape
    hidden = prepared["w1"].shape[1]
    latent_dim = prepared["w2"].shape[1]

    # Batch tiling.  tb_max=1024 keeps per-step overhead amortized (>=85% of
    # HBM roofline per the measured tiling data) while the double-buffered
    # working set stays ~3 MB, far under scoped-VMEM on every generation
    # (incl. v7x 64 MiB).  Aim for >= 2 grid steps so the "parallel" batch
    # axis can shard across both TensorCores on v7x.
    B_sub = _round_up(B, 8)
    TB = min(tb_max, max(8, _round_up(pl.cdiv(B_sub, 2), 8)))
    B_pad = _round_up(B, TB)
    grid = (B_pad // TB,)

    # Only pad the batch tail when B is not a TB multiple (x stays f32).
    x_p = x if B_pad == B else jnp.pad(x, ((0, B_pad - B), (0, 0)))

    def const_spec(shape):
        # VMEM-resident operand: constant index map -> DMA'd once, reused.
        return pl.BlockSpec(shape, lambda i: (0, 0))

    in_specs = [
        pl.BlockSpec((TB, input_dim), lambda i: (i, 0)),   # x tile (streamed, f32)
        const_spec((input_dim, hidden)), const_spec((1, hidden)),
        const_spec((hidden, latent_dim)), const_spec((1, latent_dim)),
        const_spec((latent_dim, hidden)), const_spec((1, hidden)),
        const_spec((hidden, input_dim)),  const_spec((1, input_dim)),
    ]
    # Native-width outputs (last dim == full array dim is a legal block shape);
    # avoids lane-padding + post-slice passes over dec/z.
    dec_spec = pl.BlockSpec((TB, input_dim), lambda i: (i, 0))
    z_spec = pl.BlockSpec((TB, latent_dim), lambda i: (i, 0))

    cparams = pltpu.CompilerParams(dimension_semantics=("parallel",))

    args = (x_p,
            prepared["w1"], prepared["b1"], prepared["w2"], prepared["b2"],
            prepared["w3"], prepared["b3"], prepared["w4"], prepared["b4"])

    if return_latent:
        dec_out, z_out = pl.pallas_call(
            _ae_kernel_with_latent,
            grid=grid,
            out_shape=(jax.ShapeDtypeStruct((B_pad, input_dim), jnp.float32),
                       jax.ShapeDtypeStruct((B_pad, latent_dim), jnp.float32)),
            in_specs=in_specs,
            out_specs=(dec_spec, z_spec),
            compiler_params=cparams,
        )(*args)
        if B_pad != B:
            dec_out, z_out = dec_out[:B], z_out[:B]
        return dec_out, z_out
    else:
        # z never written back to HBM in this variant.
        dec_out = pl.pallas_call(
            _ae_kernel_dec_only,
            grid=grid,
            out_shape=jax.ShapeDtypeStruct((B_pad, input_dim), jnp.float32),
            in_specs=in_specs,
            out_specs=dec_spec,
            compiler_params=cparams,
        )(*args)
        if B_pad != B:
            dec_out = dec_out[:B]
        return dec_out


def init_params(key, input_dim, latent_dim, hidden=256):
    """nn.Linear-style init: uniform +/- 1/sqrt(fan_in); weights stored [in, out]."""
    ks = jax.random.split(key, 8)

    def linear(kw, kb, fan_in, fan_out):
        bound = 1.0 / jnp.sqrt(fan_in)
        w = jax.random.uniform(kw, (fan_in, fan_out), jnp.float32, -bound, bound)
        b = jax.random.uniform(kb, (1, fan_out), jnp.float32, -bound, bound)
        return w, b

    w1, b1 = linear(ks[0], ks[1], input_dim, hidden)      # encoder[0]
    w2, b2 = linear(ks[2], ks[3], hidden, latent_dim)     # encoder[3]
    w3, b3 = linear(ks[4], ks[5], latent_dim, hidden)     # decoder[0]
    w4, b4 = linear(ks[6], ks[7], hidden, input_dim)      # decoder[2]
    return dict(w1=w1, b1=b1, w2=w2, b2=b2, w3=w3, b3=b3, w4=w4, b4=b4)


def _reference_forward(x, p):
    """Pure-JAX reference using the same bf16-operand / f32-accumulate recipe."""
    xb = x.astype(jnp.bfloat16)
    w1 = p["w1"].astype(jnp.bfloat16)
    w2 = p["w2"].astype(jnp.bfloat16)
    w3 = p["w3"].astype(jnp.bfloat16)
    w4 = p["w4"].astype(jnp.bfloat16)
    h1 = jnp.maximum(jnp.dot(xb, w1, preferred_element_type=jnp.float32) + p["b1"], 0.0)
    z = jnp.dot(h1.astype(jnp.bfloat16), w2, preferred_element_type=jnp.float32) + p["b2"]
    h2 = jnp.maximum(jnp.dot(z.astype(jnp.bfloat16), w3,
                             preferred_element_type=jnp.float32) + p["b3"], 0.0)
    dec = jnp.dot(h2.astype(jnp.bfloat16), w4, preferred_element_type=jnp.float32) + p["b4"]
    return dec, z


if __name__ == "__main__":
    key = jax.random.PRNGKey(0)
    k_x, k_p = jax.random.split(key)

    B, input_dim, latent_dim = 8, 64, 32
    x = jax.random.normal(k_x, (B, input_dim), dtype=jnp.float32)
    params = init_params(k_p, input_dim, latent_dim)
    prepared = prepare_params(params)

    # Variant with latent output.
    decoded, z = simple_autoencoder_forward(x, prepared, return_latent=True)
    decoded = jax.block_until_ready(decoded)
    z = jax.block_until_ready(z)

    # Default variant (no z writeback).
    decoded_only = jax.block_until_ready(
        simple_autoencoder_forward(x, prepared, return_latent=False))

    # Also exercise a non-multiple-of-TB batch to check the padded-tail path.
    B2 = 13
    x2 = jax.random.normal(k_x, (B2, input_dim), dtype=jnp.float32)
    dec2 = jax.block_until_ready(
        simple_autoencoder_forward(x2, prepared, return_latent=False))

    ref_dec, ref_z = _reference_forward(x, params)
    ref_dec2, _ = _reference_forward(x2, params)
    assert decoded.shape == (B, input_dim) and z.shape == (B, latent_dim)
    assert decoded_only.shape == (B, input_dim)
    assert dec2.shape == (B2, input_dim)
    assert jnp.allclose(decoded, ref_dec, atol=5e-3, rtol=5e-3)
    assert jnp.allclose(z, ref_z, atol=5e-3, rtol=5e-3)
    assert jnp.allclose(decoded_only, ref_dec, atol=5e-3, rtol=5e-3)
    assert jnp.allclose(dec2, ref_dec2, atol=5e-3, rtol=5e-3)

    print("KERNEL_OK")
</pallas_src>

<mosaic_0001>
module attributes {stable_mosaic.version = 11 : i64} {
  func.func @_ae_kernel_with_latent(%arg0: i32, %arg1: memref<8x64xf32, #tpu.memory_space<vmem>>, %arg2: memref<64x256xbf16, #tpu.memory_space<vmem>>, %arg3: memref<1x256xf32, #tpu.memory_space<vmem>>, %arg4: memref<256x32xbf16, #tpu.memory_space<vmem>>, %arg5: memref<1x32xf32, #tpu.memory_space<vmem>>, %arg6: memref<32x256xbf16, #tpu.memory_space<vmem>>, %arg7: memref<1x256xf32, #tpu.memory_space<vmem>>, %arg8: memref<256x64xbf16, #tpu.memory_space<vmem>>, %arg9: memref<1x64xf32, #tpu.memory_space<vmem>>, %arg10: memref<8x64xf32, #tpu.memory_space<vmem>>, %arg11: memref<8x32xf32, #tpu.memory_space<vmem>>) attributes {dimension_semantics = [#tpu.dimension_semantics<parallel>], iteration_bounds = array<i64: 1>, scalar_prefetch = 0 : i64, scratch_operands = 0 : i64, tpu.core_type = #tpu.core_type<tc>, window_params = [{transform_indices = @transform_0, window_bounds = array<i64: 8, 64>}, {pipeline_mode = #tpu.pipeline_mode<synchronous>, transform_indices = @transform_1, window_bounds = array<i64: 64, 256>}, {pipeline_mode = #tpu.pipeline_mode<synchronous>, transform_indices = @transform_2, window_bounds = array<i64: 1, 256>}, {pipeline_mode = #tpu.pipeline_mode<synchronous>, transform_indices = @transform_3, window_bounds = array<i64: 256, 32>}, {pipeline_mode = #tpu.pipeline_mode<synchronous>, transform_indices = @transform_4, window_bounds = array<i64: 1, 32>}, {pipeline_mode = #tpu.pipeline_mode<synchronous>, transform_indices = @transform_5, window_bounds = array<i64: 32, 256>}, {pipeline_mode = #tpu.pipeline_mode<synchronous>, transform_indices = @transform_6, window_bounds = array<i64: 1, 256>}, {pipeline_mode = #tpu.pipeline_mode<synchronous>, transform_indices = @transform_7, window_bounds = array<i64: 256, 64>}, {pipeline_mode = #tpu.pipeline_mode<synchronous>, transform_indices = @transform_8, window_bounds = array<i64: 1, 64>}, {transform_indices = @transform_9, window_bounds = array<i64: 8, 64>}, {transform_indices = @transform_10, window_bounds = array<i64: 8, 32>}]} {
    %c0 = arith.constant 0 : index
    %c0_0 = arith.constant 0 : index
    %0 = vector.load %arg1[%c0, %c0_0] : memref<8x64xf32, #tpu.memory_space<vmem>>, vector<8x64xf32>
    %1 = arith.truncf %0 : vector<8x64xf32> to vector<8x64xbf16>
    %c0_1 = arith.constant 0 : index
    %c0_2 = arith.constant 0 : index
    %2 = vector.load %arg2[%c0_1, %c0_2] : memref<64x256xbf16, #tpu.memory_space<vmem>>, vector<64x256xbf16>
    %cst = arith.constant dense<0.000000e+00> : vector<8x256xf32>
    %3 = tpu.matmul %1, %2, %cst {dimension_numbers = #tpu.dot_dimension_numbers<[1], [0], [0], [1], [0, 0, 1, 1], [], []>} : vector<8x64xbf16>, vector<64x256xbf16>, vector<8x256xf32> -> vector<8x256xf32>
    %c0_3 = arith.constant 0 : index
    %c0_4 = arith.constant 0 : index
    %4 = vector.load %arg3[%c0_3, %c0_4] : memref<1x256xf32, #tpu.memory_space<vmem>>, vector<1x256xf32>
    %5 = vector.broadcast %4 : vector<1x256xf32> to vector<8x256xf32>
    %6 = arith.addf %3, %5 : vector<8x256xf32>
    %cst_5 = arith.constant 0.000000e+00 : f32
    %7 = vector.broadcast %cst_5 : f32 to vector<8x256xf32>
    %8 = arith.maximumf %6, %7 : vector<8x256xf32>
    %9 = arith.truncf %8 : vector<8x256xf32> to vector<8x256xbf16>
    %c0_6 = arith.constant 0 : index
    %c0_7 = arith.constant 0 : index
    %10 = vector.load %arg4[%c0_6, %c0_7] : memref<256x32xbf16, #tpu.memory_space<vmem>>, vector<256x32xbf16>
    %cst_8 = arith.constant dense<0.000000e+00> : vector<8x32xf32>
    %11 = tpu.matmul %9, %10, %cst_8 {dimension_numbers = #tpu.dot_dimension_numbers<[1], [0], [0], [1], [0, 0, 1, 1], [], []>} : vector<8x256xbf16>, vector<256x32xbf16>, vector<8x32xf32> -> vector<8x32xf32>
    %c0_9 = arith.constant 0 : index
    %c0_10 = arith.constant 0 : index
    %12 = vector.load %arg5[%c0_9, %c0_10] : memref<1x32xf32, #tpu.memory_space<vmem>>, vector<1x32xf32>
    %13 = vector.broadcast %12 : vector<1x32xf32> to vector<8x32xf32>
    %14 = arith.addf %11, %13 : vector<8x32xf32>
    %15 = arith.truncf %14 : vector<8x32xf32> to vector<8x32xbf16>
    %c0_11 = arith.constant 0 : index
    %c0_12 = arith.constant 0 : index
    %16 = vector.load %arg6[%c0_11, %c0_12] : memref<32x256xbf16, #tpu.memory_space<vmem>>, vector<32x256xbf16>
    %cst_13 = arith.constant dense<0.000000e+00> : vector<8x256xf32>
    %17 = tpu.matmul %15, %16, %cst_13 {dimension_numbers = #tpu.dot_dimension_numbers<[1], [0], [0], [1], [0, 0, 1, 1], [], []>} : vector<8x32xbf16>, vector<32x256xbf16>, vector<8x256xf32> -> vector<8x256xf32>
    %c0_14 = arith.constant 0 : index
    %c0_15 = arith.constant 0 : index
    %18 = vector.load %arg7[%c0_14, %c0_15] : memref<1x256xf32, #tpu.memory_space<vmem>>, vector<1x256xf32>
    %19 = vector.broadcast %18 : vector<1x256xf32> to vector<8x256xf32>
    %20 = arith.addf %17, %19 : vector<8x256xf32>
    %cst_16 = arith.constant 0.000000e+00 : f32
    %21 = vector.broadcast %cst_16 : f32 to vector<8x256xf32>
    %22 = arith.maximumf %20, %21 : vector<8x256xf32>
    %23 = arith.truncf %22 : vector<8x256xf32> to vector<8x256xbf16>
    %c0_17 = arith.constant 0 : index
    %c0_18 = arith.constant 0 : index
    %24 = vector.load %arg8[%c0_17, %c0_18] : memref<256x64xbf16, #tpu.memory_space<vmem>>, vector<256x64xbf16>
    %cst_19 = arith.constant dense<0.000000e+00> : vector<8x64xf32>
    %25 = tpu.matmul %23, %24, %cst_19 {dimension_numbers = #tpu.dot_dimension_numbers<[1], [0], [0], [1], [0, 0, 1, 1], [], []>} : vector<8x256xbf16>, vector<256x64xbf16>, vector<8x64xf32> -> vector<8x64xf32>
    %c0_20 = arith.constant 0 : index
    %c0_21 = arith.constant 0 : index
    %26 = vector.load %arg9[%c0_20, %c0_21] : memref<1x64xf32, #tpu.memory_space<vmem>>, vector<1x64xf32>
    %27 = vector.broadcast %26 : vector<1x64xf32> to vector<8x64xf32>
    %28 = arith.addf %25, %27 : vector<8x64xf32>
    %c0_22 = arith.constant 0 : index
    %c0_23 = arith.constant 0 : index
    %29 = vector.load %arg10[%c0_22, %c0_23] : memref<8x64xf32, #tpu.memory_space<vmem>>, vector<8x64xf32>
    tpu.vector_store %arg10[%c0_22, %c0_23], %28 {strides = array<i32>} : memref<8x64xf32, #tpu.memory_space<vmem>>, vector<8x64xf32>,
    %c0_24 = arith.constant 0 : index
    %c0_25 = arith.constant 0 : index
    %30 = vector.load %arg11[%c0_24, %c0_25] : memref<8x32xf32, #tpu.memory_space<vmem>>, vector<8x32xf32>
    tpu.vector_store %arg11[%c0_24, %c0_25], %14 {strides = array<i32>} : memref<8x32xf32, #tpu.memory_space<vmem>>, vector<8x32xf32>,
    return
  }
  func.func @transform_0(%arg0: i32) -> (i32, i32) {
    %c0_i32 = arith.constant 0 : i32
    %c0_i32_0 = arith.constant 0 : i32
    return %arg0, %c0_i32 : i32, i32
  }
  func.func @transform_1(%arg0: i32) -> (i32, i32) {
    %c0_i32 = arith.constant 0 : i32
    %c0_i32_0 = arith.constant 0 : i32
    %c0_i32_1 = arith.constant 0 : i32
    return %c0_i32, %c0_i32_0 : i32, i32
  }
  func.func @transform_2(%arg0: i32) -> (i32, i32) {
    %c0_i32 = arith.constant 0 : i32
    %c0_i32_0 = arith.constant 0 : i32
    %c0_i32_1 = arith.constant 0 : i32
    return %c0_i32, %c0_i32_0 : i32, i32
  }
  func.func @transform_3(%arg0: i32) -> (i32, i32) {
    %c0_i32 = arith.constant 0 : i32
    %c0_i32_0 = arith.constant 0 : i32
    %c0_i32_1 = arith.constant 0 : i32
    return %c0_i32, %c0_i32_0 : i32, i32
  }
  func.func @transform_4(%arg0: i32) -> (i32, i32) {
    %c0_i32 = arith.constant 0 : i32
    %c0_i32_0 = arith.constant 0 : i32
    %c0_i32_1 = arith.constant 0 : i32
    return %c0_i32, %c0_i32_0 : i32, i32
  }
  func.func @transform_5(%arg0: i32) -> (i32, i32) {
    %c0_i32 = arith.constant 0 : i32
    %c0_i32_0 = arith.constant 0 : i32
    %c0_i32_1 = arith.constant 0 : i32
    return %c0_i32, %c0_i32_0 : i32, i32
  }
  func.func @transform_6(%arg0: i32) -> (i32, i32) {
    %c0_i32 = arith.constant 0 : i32
    %c0_i32_0 = arith.constant 0 : i32
    %c0_i32_1 = arith.constant 0 : i32
    return %c0_i32, %c0_i32_0 : i32, i32
  }
  func.func @transform_7(%arg0: i32) -> (i32, i32) {
    %c0_i32 = arith.constant 0 : i32
    %c0_i32_0 = arith.constant 0 : i32
    %c0_i32_1 = arith.constant 0 : i32
    return %c0_i32, %c0_i32_0 : i32, i32
  }
  func.func @transform_8(%arg0: i32) -> (i32, i32) {
    %c0_i32 = arith.constant 0 : i32
    %c0_i32_0 = arith.constant 0 : i32
    %c0_i32_1 = arith.constant 0 : i32
    return %c0_i32, %c0_i32_0 : i32, i32
  }
  func.func @transform_9(%arg0: i32) -> (i32, i32) {
    %c0_i32 = arith.constant 0 : i32
    %c0_i32_0 = arith.constant 0 : i32
    return %arg0, %c0_i32 : i32, i32
  }
  func.func @transform_10(%arg0: i32) -> (i32, i32) {
    %c0_i32 = arith.constant 0 : i32
    %c0_i32_0 = arith.constant 0 : i32
    return %arg0, %c0_i32 : i32, i32
  }
}

</mosaic_0001>

<bundles_post_ra>
// kernel: simple_autoencoder_forward.1
= control target key start
LH: loop header
LB: loop body
LE: loop exit
PB: predicated region body
PF: predicated region fallthrough
CT: control target
= control target key end

     0   :  { %16 = vsyncpa [#allocation3], 0  ;;  %s1071_s0 = inlined_call_operand.vmem [shape: f32[8,64], index: 0, kind: input, shape index: {}]   ;;  %s1072_s1 = inlined_call_operand.vmem [shape: bf16[64,256], index: 1, kind: input, shape index: {}]   ;;  %s1073_s2 = inlined_call_operand.vmem [shape: f32[1,256], index: 2, kind: input, shape index: {}]   ;;  %s1074_s3 = inlined_call_operand.vmem [shape: bf16[256,32], index: 3, kind: input, shape index: {}]   ;;  %s1075_s4 = inlined_call_operand.vmem [shape: f32[1,32], index: 4, kind: input, shape index: {}]   ;;  %s1076_s5 = inlined_call_operand.vmem [shape: bf16[32,256], index: 5, kind: input, shape index: {}]   ;;  %s1077_s6 = inlined_call_operand.vmem [shape: f32[1,256], index: 6, kind: input, shape index: {}]   ;;  %s1078_s7 = inlined_call_operand.vmem [shape: bf16[256,64], index: 7, kind: input, shape index: {}]   ;;  %s1079_s8 = inlined_call_operand.vmem [shape: f32[1,64], index: 8, kind: input, shape index: {}]   ;;  %s1080_s9 = inlined_call_operand.hbm [shape: f32[8,64], index: 9, kind: output, shape index: {0}]   ;;  %s1081_s10 = inlined_call_operand.hbm [shape: f32[8,32], index: 10, kind: output, shape index: {1}]  }
   0x1   :  { %v568_v0 = vld [vmem:[%s1072_s1 + $0x30] sm:$0xf]  ;;  %v729_v1 = vld [vmem:[%s1072_s1 + $0x34] sm:$0xf0]  ;;  %v728_v2 = vld [vmem:[%s1072_s1 + $0x34] sm:$0xf] }
   0x2   :  { %v569_v3 = vor.u32 %v729_v1, %v568_v0  ;;  %v570_v4 = vld [vmem:[%s1072_s1 + $0x38] sm:$0xf0]  ;;  %v560_v5 = vld [vmem:[%s1072_s1 + $0x20] sm:$0xf]  ;;  %v727_v6 = vld [vmem:[%s1072_s1 + $0x24] sm:$0xf0] }
   0x3   :  { %v573_v7 = vor.u32 %v728_v2, %v570_v4  ;;  %v726_v8 = vld [vmem:[%s1072_s1 + $0x24] sm:$0xf]  ;;  %v562_v9 = vld [vmem:[%s1072_s1 + $0x28] sm:$0xf0]  ;;  %v561_v10 = vor.u32 %v727_v6, %v560_v5  ;;  %v552_v12 = vld [vmem:[%s1072_s1 + $0x10] sm:$0xf] }
   0x4   :  { %101 = vmatpush.bf16.msra.mxu2 %v569_v3  ;;  %v565_v11 = vor.u32 %v726_v8, %v562_v9  ;;  %v725_v13 = vld [vmem:[%s1072_s1 + $0x14] sm:$0xf0]  ;;  %v724_v14 = vld [vmem:[%s1072_s1 + $0x14] sm:$0xf]  ;;  %v554_v15 = vld [vmem:[%s1072_s1 + $0x18] sm:$0xf0] }
   0x5   :  { %114 = vmatpush.bf16.msra.mxu3 %v573_v7  ;;  %v553_v16 = vor.u32 %v725_v13, %v552_v12  ;;  %v557_v17 = vor.u32 %v724_v14, %v554_v15  ;;  %v544_v18 = vld [vmem:[%s1072_s1] sm:$0xf]  ;;  %v723_v19 = vld [vmem:[%s1072_s1 + $0x4] sm:$0xf0]  ;;  %v722_v20 = vld [vmem:[%s1072_s1 + $0x4] sm:$0xf] }
   0x6   :  { %v546_v21 = vld [vmem:[%s1072_s1 + $0x8] sm:$0xf0]  ;;  %v545_v22 = vor.u32 %v723_v19, %v544_v18  ;;  %v37_v23 = vld [vmem:[%s1071_s0] sm:$0xff] }
   0x8   :  { %102 = vmatpush.bf16.msra.mxu2 %v561_v10 }
   0x9   :  { %115 = vmatpush.bf16.msra.mxu3 %v565_v11 }
   0xc   :  { %103 = vmatpush.bf16.msra.mxu2 %v553_v16 }
   0xd   :  { %17 = vsyncpa [#allocation5], 0  ;;  %116 = vmatpush.bf16.msra.mxu3 %v557_v17  ;;  %v549_v24 = vor.u32 %v722_v20, %v546_v21  ;;  %v737_v25 = vld [vmem:[%s1074_s3 + $0x38] sm:$0xff]  ;;  %v38_v27 = vpack.c.bf16 %v37_v23, %v37_v23  ;;  %vm93_vm0 = vcmask 523264   ;;  %v736_v28 = vld [vmem:[%s1074_s3 + $0x30] sm:$0xff]  ;;  %vm316_vm1 = vcmask 261120  }
   0xe   :  { %v745_v26 = vld [vmem:[%s1074_s3 + $0x78] sm:$0xff]  ;;  %v744_v29 = vld [vmem:[%s1074_s3 + $0x70] sm:$0xff]  ;;  %v735_v30 = vld [vmem:[%s1074_s3 + $0x28] sm:$0xff]  ;;  %s823_s21 = smov [#allocation2]   ;;  %s517_s25 = sshll.u32 %s1080_s9, 4  ;;  %s518_s25 = int_to_ptr.hbm [resolvable:$true] %s517_s25 }
   0xf   :  { %v743_v31 = vld [vmem:[%s1074_s3 + $0x68] sm:$0xff]  ;;  %v734_v32 = vld [vmem:[%s1074_s3 + $0x20] sm:$0xff]  ;;  %v733_v34 = vld [vmem:[%s1074_s3 + $0x18] sm:$0xff]  ;;  %s515_s22 = sshll.u32 %s823_s21, 4  ;;  %s516_s22 = int_to_ptr.vmem [resolvable:$true] %s515_s22 }
  0x10   :  { %104 = vmatpush.bf16.msra.mxu2 %v545_v22  ;;  %v742_v33 = vld [vmem:[%s1074_s3 + $0x60] sm:$0xff]  ;;  %v741_v35 = vld [vmem:[%s1074_s3 + $0x58] sm:$0xff]  ;;  %v732_v36 = vld [vmem:[%s1074_s3 + $0x10] sm:$0xff] }
  0x11   :  { %117 = vmatpush.bf16.msra.mxu3 %v549_v24  ;;  %v740_v37 = vld [vmem:[%s1074_s3 + $0x50] sm:$0xff]  ;;  %v731_v38 = vld [vmem:[%s1074_s3 + $0x8] sm:$0xff]  ;;  %v730_v40 = vld [vmem:[%s1074_s3] sm:$0xff] }
  0x12   :  { %v739_v39 = vld [vmem:[%s1074_s3 + $0x48] sm:$0xff]  ;;  %v738_v41 = vld [vmem:[%s1074_s3 + $0x40] sm:$0xff]  ;;  %v650_v55 = vld [vmem:[%s1076_s5 + $0x10] sm:$0xf] }
  0x13   :  { %574 = vmatmul.msk.bf16.vlgmr.msra.gmra.mxu2 %vm93_vm0, %v38_v27  ;;  %v47_v42 = vld [vmem:[%s1073_s2] sm:$0x3]  ;;  %v749_v56 = vld [vmem:[%s1076_s5 + $0x14] sm:$0xf0]  ;;  %v748_v57 = vld [vmem:[%s1076_s5 + $0x14] sm:$0xf] }
  0x14   :  { %259 = vmatpush.bf16.msrb.mxu2 %v737_v25  ;;  %575 = vmatmul.msk.bf16.vlgmr.msra.gmra.mxu3 %vm93_vm0, %v38_v27  ;;  %v49_v43 = vperm.slane %v47_v42, 0  ;;  %v50_v44 = vperm.slane %v47_v42, 1  ;;  %v651_v58 = vor.u32 %v749_v56, %v650_v55  ;;  %v652_v59 = vld [vmem:[%s1076_s5 + $0x18] sm:$0xf0]  ;;  %v642_v61 = vld [vmem:[%s1076_s5] sm:$0xf] }
  0x15   :  { %272 = vmatpush.bf16.msrb.mxu3 %v745_v26  ;;  %v655_v60 = vor.u32 %v748_v57, %v652_v59  ;;  %v747_v62 = vld [vmem:[%s1076_s5 + $0x4] sm:$0xf0]  ;;  %v746_v63 = vld [vmem:[%s1076_s5 + $0x4] sm:$0xf]  ;;  %v644_v1 = vld [vmem:[%s1076_s5 + $0x8] sm:$0xf0] }
  0x16   :  { %326 = vmatpush.bf16.msra.mxu0 %v651_v58  ;;  %v643_v0 = vor.u32 %v747_v62, %v642_v61  ;;  %v647_v2 = vor.u32 %v746_v63, %v644_v1  ;;  %v757_v3 = vld [vmem:[%s1078_s7 + $0x38] sm:$0xff]  ;;  %v756_v5 = vld [vmem:[%s1078_s7 + $0x30] sm:$0xff]  ;;  %v755_v7 = vld [vmem:[%s1078_s7 + $0x28] sm:$0xff] }
  0x17   :  { %339 = vmatpush.bf16.msra.mxu1 %v655_v60  ;;  %v765_v4 = vld [vmem:[%s1078_s7 + $0x78] sm:$0xff]  ;;  %v764_v6 = vld [vmem:[%s1078_s7 + $0x70] sm:$0xff]  ;;  %v763_v8 = vld [vmem:[%s1078_s7 + $0x68] sm:$0xff] }
  0x18   :  { %260 = vmatpush.bf16.msrb.mxu2 %v736_v28  ;;  %v754_v9 = vld [vmem:[%s1078_s7 + $0x20] sm:$0xff]  ;;  %v753_v11 = vld [vmem:[%s1078_s7 + $0x18] sm:$0xff]  ;;  %v752_v13 = vld [vmem:[%s1078_s7 + $0x10] sm:$0xff] }
  0x19   :  { %273 = vmatpush.bf16.msrb.mxu3 %v744_v29  ;;  %v762_v10 = vld [vmem:[%s1078_s7 + $0x60] sm:$0xff]  ;;  %v761_v12 = vld [vmem:[%s1078_s7 + $0x58] sm:$0xff]  ;;  %v760_v14 = vld [vmem:[%s1078_s7 + $0x50] sm:$0xff] }
  0x1a   :  { %327 = vmatpush.bf16.msra.mxu0 %v643_v0  ;;  %v768_v15 = vld [vmem:[%s1075_s4] ss:$0 sm:$0xff]  ;;  %v751_v23 = vld [vmem:[%s1078_s7 + $0x8] sm:$0xff] }
  0x1b   :  { %340 = vmatpush.bf16.msra.mxu1 %v647_v2  ;;  %v759_v24 = vld [vmem:[%s1078_s7 + $0x48] sm:$0xff]  ;;  %v750_v25 = vld [vmem:[%s1078_s7] sm:$0xff] }
  0x1c   :  { %261 = vmatpush.bf16.msrb.mxu2 %v735_v30  ;;  %v758_v26 = vld [vmem:[%s1078_s7 + $0x40] sm:$0xff]  ;;  %s822_s7 = smov [#allocation4]  }
  0x1d   :  { %274 = vmatpush.bf16.msrb.mxu3 %v743_v31  ;;  %v290_v27 = vld [vmem:[%s1077_s6] sm:$0x3]  ;;  %s526_s17 = sshll.u32 %s822_s7, 4  ;;  %s528_s6 = sshll.u32 %s1081_s10, 4  ;;  %s527_s17 = int_to_ptr.vmem [resolvable:$true] %s526_s17  ;;  %s529_s6 = int_to_ptr.hbm [resolvable:$true] %s528_s6 }
  0x1e   :  { %482 = vmatpush.bf16.msrb.mxu0 %v757_v3  ;;  %v292_v28 = vperm.slane %v290_v27, 0  ;;  %v293_v29 = vperm.slane %v290_v27, 1 }
  0x1f   :  { %495 = vmatpush.bf16.msrb.mxu1 %v765_v4 }
  0x20   :  { %262 = vmatpush.bf16.msrb.mxu2 %v734_v32 }
  0x21   :  { %275 = vmatpush.bf16.msrb.mxu3 %v742_v33 }
  0x22   :  { %483 = vmatpush.bf16.msrb.mxu0 %v756_v5 }
  0x23   :  { %496 = vmatpush.bf16.msrb.mxu1 %v764_v6 }
  0x24   :  { %263 = vmatpush.bf16.msrb.mxu2 %v733_v34 }
  0x25   :  { %276 = vmatpush.bf16.msrb.mxu3 %v741_v35 }
  0x26   :  { %484 = vmatpush.bf16.msrb.mxu0 %v755_v7 }
  0x27   :  { %497 = vmatpush.bf16.msrb.mxu1 %v763_v8 }
  0x28   :  { %264 = vmatpush.bf16.msrb.mxu2 %v732_v36 }
  0x29   :  { %277 = vmatpush.bf16.msrb.mxu3 %v740_v37 }
  0x2a   :  { %485 = vmatpush.bf16.msrb.mxu0 %v754_v9 }
  0x2b   :  { %498 = vmatpush.bf16.msrb.mxu1 %v762_v10 }
  0x2c   :  { %265 = vmatpush.bf16.msrb.mxu2 %v731_v38 }
  0x2d   :  { %278 = vmatpush.bf16.msrb.mxu3 %v739_v39 }
  0x2e   :  { %486 = vmatpush.bf16.msrb.mxu0 %v753_v11 }
  0x2f   :  { %499 = vmatpush.bf16.msrb.mxu1 %v761_v12 }
  0x30   :  { %266 = vmatpush.bf16.msrb.mxu2 %v730_v40  ;;  %v769_v40 = vld [vmem:[%s1079_s8] ss:$0 sm:$0xff] }
  0x31   :  { %279 = vmatpush.bf16.msrb.mxu3 %v738_v41 }
  0x32   :  { %487 = vmatpush.bf16.msrb.mxu0 %v752_v13 }
  0x33   :  { %500 = vmatpush.bf16.msrb.mxu1 %v760_v14 }
  0x36   :  { %488 = vmatpush.bf16.msrb.mxu0 %v751_v23 }
  0x37   :  { %501 = vmatpush.bf16.msrb.mxu1 %v759_v24 }
  0x3a   :  { %489 = vmatpush.bf16.msrb.mxu0 %v750_v25 }
  0x3b   :  { %502 = vmatpush.bf16.msrb.mxu1 %v758_v26 }
  0x96   :  { %v106_v45 = vpop.f32.mrf.mxu2 }
  0x97   :  { %v107_v46 = vadd.f32 %v106_v45, %v49_v43  ;;  %v119_v47 = vpop.f32.mrf.mxu3 }
  0x98   :  { %v120_v48 = vadd.f32 %v119_v47, %v50_v44 }
  0x99   :  { %v123_v49 = vmax.f32 %v107_v46, 0.0 }
  0x9a   :  { %v124_v50 = vmax.f32 %v120_v48, 0.0 }
  0x9b   :  { %v125_v51 = vpack.c.bf16 %v123_v49, %v123_v49 }
  0x9c   :  { %v126_v52 = vpack.c.bf16 %v124_v50, %v124_v50 }
  0x9d   :  { %267 = vmatmul.bf16.vlgmr.msrb.gmra.mxu2 %v125_v51 }
  0x9e   :  { %280 = vmatmul.bf16.vlgmr.msrb.gmra.mxu3 %v126_v52  ;;  %v108_v53 = vpop.f32.mrf.mxu2 }
  0x9f   :  { %v121_v54 = vpop.f32.mrf.mxu3 }
 0x120   :  { %v268_v16 = vpop.f32.mrf.mxu2 }
 0x121   :  { %v269_v17 = vadd.f32 %v768_v15, %v268_v16  ;;  %v281_v18 = vpop.f32.mrf.mxu3 }
 0x123   :  { %v282_v19 = vadd.f32 %v281_v18, %v269_v17 }
 0x125   :  { %v285_v20 = vpack.c.bf16 %v282_v19, %v282_v19  ;;  %509 = vst.msk [vmem:[#allocation4] sm:$0xff] %vm316_vm1, %v282_v19 }
 0x126   :  { %531 = dma.vmem_to_hbm [thread:$0]  %s527_s17, 128, %s529_s6, [#allocation5]  }
 0x127   :  { %656 = vmatmul.msk.bf16.vlgmr.msra.gmra.mxu0 %vm316_vm1, %v285_v20  ;;  %657 = vmatmul.msk.bf16.vlgmr.msra.gmra.mxu1 %vm316_vm1, %v285_v20 }
 0x128   :  { %v270_v21 = vpop.f32.mrf.mxu2 }
 0x129   :  { %v283_v22 = vpop.f32.mrf.mxu3 }
 0x1a4   :  { %v329_v30 = vpop.f32.mrf.mxu0  ;;  %v342_v31 = vpop.f32.mrf.mxu1 }
 0x1a5   :  { %v330_v32 = vadd.f32 %v329_v30, %v292_v28  ;;  %v343_v33 = vadd.f32 %v342_v31, %v293_v29 }
 0x1a7   :  { %v346_v34 = vmax.f32 %v330_v32, 0.0  ;;  %v347_v35 = vmax.f32 %v343_v33, 0.0 }
 0x1a9   :  { %v348_v36 = vpack.c.bf16 %v346_v34, %v346_v34  ;;  %v349_v37 = vpack.c.bf16 %v347_v35, %v347_v35 }
 0x1ab   :  { %490 = vmatmul.bf16.vlgmr.msrb.gmra.mxu0 %v348_v36  ;;  %503 = vmatmul.bf16.vlgmr.msrb.gmra.mxu1 %v349_v37 }
 0x1ac   :  { %v331_v38 = vpop.f32.mrf.mxu0  ;;  %v344_v39 = vpop.f32.mrf.mxu1 }
 0x228   :  { %v491_v41 = vpop.f32.mrf.mxu0  ;;  %v504_v42 = vpop.f32.mrf.mxu1 }
 0x229   :  { %v492_v43 = vadd.f32 %v769_v40, %v491_v41 }
 0x22b   :  { %v505_v44 = vadd.f32 %v504_v42, %v492_v43 }
 0x22d   :  { %508 = vst.msk [vmem:[#allocation2] sm:$0xff] %vm93_vm0, %v505_v44 }
 0x22e   :  { %520 = dma.vmem_to_hbm [thread:$0]  %s516_s22, 128, %s518_s25, [#allocation3]  }
 0x230   :  { %v493_v45 = vpop.f32.mrf.mxu0  ;;  %v506_v46 = vpop.f32.mrf.mxu1 }
 0x231   :  { %818 = dma.done.wait [#allocation3], 128  }
 0x232   :  { %819 = vsyncadd [#allocation3], 4294967168 }
 0x233   :  { %820 = dma.done.wait [#allocation5], 128  }
 0x234   :  { %821 = vsyncadd [#allocation5], 4294967168 }
 0x235   :  { %540 = vsyncpa [#allocation3], 1 }
 0x236   :  { %541 = vsyncpa [#allocation5], 1 }

</bundles_post_ra>
